<compile_context>
chip_gen: v5e
topology: v5e:2x2
jax: 0.10.0
libtpu: 0.0.40
codegen_flags: <defaults>
</compile_context>

<pallas_src>
import functools

import jax
import jax.numpy as jnp
from jax import lax
from jax.experimental import pallas as pl
from jax.experimental.pallas import tpu as pltpu


_NEG_BIG = -1.0e30  # finite "-inf" for padded vocab columns (avoids inf-inf NaNs)


def _round_up(x, m):
    return ((x + m - 1) // m) * m


def _cdiv(a, b):
    return (a + b - 1) // b


def _device_defaults():
    """Per-generation (tm, tv) defaults + conservative VMEM budget (bytes)."""
    kind = ""
    try:
        kind = jax.devices()[0].device_kind.lower()
    except Exception:
        pass
    cap = None
    try:
        cap = int(getattr(pltpu.get_tpu_info(), "vmem_capacity_bytes", 0)) or None
    except Exception:
        cap = None
    if "v5" in kind and ("lite" in kind or "v5e" in kind):
        tm, tv = 256, 2048            # v5e: ~240 flops/byte crossover, 4x128 MXU
        cap = cap or (128 << 20)
    elif "v6" in kind:
        tm, tv = 512, 2048            # v6e: ~700 flops/byte crossover
        cap = cap or (128 << 20)
    else:
        tm, tv = 512, 2048            # v7x / unknown: ~310 flops/byte crossover
        cap = cap or (64 << 20)       # v7x has only 64 MiB VMEM per TensorCore
    budget = max(cap - (12 << 20), 16 << 20)   # headroom for Mosaic scratch
    return tm, tv, budget


# ---------------------------------------------------------------------------
# Decoder LayerNorm (the defined part of Decoder.forward).
# Note: uses the torch.nn.LayerNorm convention (eps inside rsqrt); the exact
# `L.LayerNorm` implementation is not given in the spec.
# ---------------------------------------------------------------------------
def _layernorm_kernel(x_ref, g_ref, b_ref, o_ref, *, eps):
    xv = x_ref[...].astype(jnp.float32)
    mu = jnp.mean(xv, axis=-1, keepdims=True)
    xc = xv - mu
    var = jnp.mean(xc * xc, axis=-1, keepdims=True)
    y = xc * lax.rsqrt(var + eps)
    o_ref[...] = (y * g_ref[...].astype(jnp.float32)
                  + b_ref[...].astype(jnp.float32)).astype(o_ref.dtype)


@functools.partial(jax.jit, static_argnames=("eps", "tm"))
def layer_norm(x, gamma, beta, *, eps=1e-6, tm=256):
    orig_shape = x.shape
    d = orig_shape[-1]
    x2 = x.reshape(-1, d)
    m = x2.shape[0]
    tm_ = _round_up(min(tm, _round_up(m, 8)), 8)
    out = pl.pallas_call(
        functools.partial(_layernorm_kernel, eps=eps),
        out_shape=jax.ShapeDtypeStruct((m, d), x.dtype),
        grid=(_cdiv(m, tm_),),
        in_specs=[
            pl.BlockSpec((tm_, d), lambda i: (i, 0)),
            pl.BlockSpec((1, d), lambda i: (0, 0)),
            pl.BlockSpec((1, d), lambda i: (0, 0)),
        ],
        out_specs=pl.BlockSpec((tm_, d), lambda i: (i, 0)),
        compiler_params=pltpu.CompilerParams(dimension_semantics=("parallel",)),
    )(x2, gamma.reshape(1, d), beta.reshape(1, d))
    return out.reshape(orig_shape)


def decoder_forward(x, memory, src_mask, tgt_mask, gamma, beta, n_layers, *, eps=1e-6):
    # TODO(synk): `layer(x, memory, src_mask, tgt_mask)` (self/cross attention +
    # FFN decoder layers from L.clones) is undefined in the provided spec; only
    # the per-layer LayerNorm of Decoder.forward is implemented here.
    del memory, src_mask, tgt_mask
    for _ in range(n_layers):
        x = layer_norm(x, gamma, beta, eps=eps)
    return x


# ---------------------------------------------------------------------------
# Projection + log_softmax head.
# ---------------------------------------------------------------------------
def _fused_head_kernel(x_ref, w_ref, b_ref, o_ref, m_sc, l_sc, lse_sc):
    """Grid (m_tiles, 2, v_tiles): sweep 0 = streaming logsumexp, sweep 1 =
    recompute logits and write logits - lse (no (m, vocab) f32 intermediate)."""
    s = pl.program_id(1)
    j = pl.program_id(2)
    nv = pl.num_programs(2)

    @pl.when(jnp.logical_and(s == 0, j == 0))
    def _():
        m_sc[...] = jnp.full_like(m_sc, -jnp.inf)
        l_sc[...] = jnp.zeros_like(l_sc)

    # x/w already in the MXU compute dtype (cast once in the wrapper); f32 accum.
    logits = jnp.dot(x_ref[...], w_ref[...],
                     preferred_element_type=jnp.float32) + b_ref[...]

    @pl.when(s == 0)
    def _():
        m_prev = m_sc[...]
        m_new = jnp.maximum(m_prev, jnp.max(logits, axis=-1, keepdims=True))
        l_sc[...] = l_sc[...] * jnp.exp(m_prev - m_new) + jnp.sum(
            jnp.exp(logits - m_new), axis=-1, keepdims=True)
        m_sc[...] = m_new

    @pl.when(jnp.logical_and(s == 0, j == nv - 1))
    def _():
        lse_sc[...] = m_sc[...] + jnp.log(l_sc[...])

    @pl.when(s == 1)
    def _():
        o_ref[...] = (logits - lse_sc[...]).astype(o_ref.dtype)


def _split_lse_kernel(x_ref, w_ref, b_ref, logits_ref, lsep_ref, m_sc, l_sc):
    """Decode path. Grid (m_tiles, n_split, v_half_tiles): vocab split into
    'parallel' halves (megacore on v7x); writes raw f32 logits + per-half
    partial logsumexp, combined + normalized by a fused XLA epilogue."""
    j = pl.program_id(2)
    nj = pl.num_programs(2)

    @pl.when(j == 0)
    def _():
        m_sc[...] = jnp.full_like(m_sc, -jnp.inf)
        l_sc[...] = jnp.zeros_like(l_sc)

    logits = jnp.dot(x_ref[...], w_ref[...],
                     preferred_element_type=jnp.float32) + b_ref[...]
    logits_ref[...] = logits          # f32 kept for log-prob precision

    m_prev = m_sc[...]
    m_new = jnp.maximum(m_prev, jnp.max(logits, axis=-1, keepdims=True))
    l_sc[...] = l_sc[...] * jnp.exp(m_prev - m_new) + jnp.sum(
        jnp.exp(logits - m_new), axis=-1, keepdims=True)
    m_sc[...] = m_new

    @pl.when(j == nj - 1)
    def _():
        lsep_ref[0] = m_sc[...] + jnp.log(l_sc[...])


@functools.partial(jax.jit, static_argnames=("tm", "tv", "compute_dtype"))
def generator_forward(x, w_t, b, *, tm=None, tv=None, compute_dtype=jnp.bfloat16):
    """x: (..., d_model); w_t: (d_model, vocab); b: (vocab,) -> log_softmax logits."""
    orig_shape = x.shape
    d_model = orig_shape[-1]
    vocab = w_t.shape[-1]
    out_dtype = x.dtype

    tm_def, tv_def, vmem_budget = _device_defaults()
    tm = tm_def if tm is None else tm
    tv = tv_def if tv is None else tv

    # Cast x once in the wrapper (halves its DMA; no in-kernel per-tile cast).
    x2 = x.reshape(-1, d_model).astype(compute_dtype)
    m = x2.shape[0]

    x_bytes = jnp.dtype(compute_dtype).itemsize
    w_bytes = jnp.dtype(compute_dtype).itemsize

    # Tiles: rows 16-aligned (bf16 sublane packing; large-m defaults are already
    # multiples of 256 for the MXU), vocab tiles 128-aligned (lane width).
    tm_ = _round_up(min(tm, _round_up(m, 16)), 16)
    tv_ = _round_up(min(tv, _round_up(vocab, 128)), 128)

    # Shrink tiles until the double-buffered working set fits the VMEM budget
    # (conservative f32 output-block estimate so it holds for both paths).
    def est(tm_e, tv_e):
        return (2 * tm_e * d_model * x_bytes      # x blocks
                + 2 * d_model * tv_e * w_bytes    # weight blocks
                + 2 * tv_e * 4                    # bias blocks
                + 2 * tm_e * tv_e * 4             # output blocks
                + 8 * tm_e * 4)                   # scratch / lse blocks
    while est(tm_, tv_) > vmem_budget and tv_ > 128:
        tv_ = max(128, _round_up(tv_ // 2, 128))
    while est(tm_, tv_) > vmem_budget and tm_ > 16:
        tm_ = max(16, _round_up(tm_ // 2, 16))

    m_tiles = _cdiv(m, tm_)

    # Fused recompute streams the weight twice per M tile but never materializes
    # the (m, vocab) f32 logits; it wins once tm_*8 bytes (saved f32 write+read
    # per row) exceeds d_model*w_bytes (the extra weight stream). Decode-shaped
    # calls (small m) take the split-lse path instead.
    use_fused = (m_tiles >= 2) and (tm_ * 8 >= d_model * w_bytes)

    # Ship the weight in the MXU compute dtype (halves weight HBM traffic).
    # TODO(synk): fp8 weight shipping on v7x (with per-channel scales) would halve
    # the dominant weight stream again for decode but needs an accuracy sign-off.
    w_c = w_t.astype(compute_dtype)
    b_f32 = b.astype(jnp.float32)
    out_bytes = jnp.dtype(out_dtype).itemsize

    if use_fused:
        vocab_pad = _round_up(vocab, tv_)
        nv = vocab_pad // tv_
        # Pad weight (zeros) / bias (large negative) so no in-kernel ragged-vocab
        # masking (iota + where) is needed on any tile.
        w_p = jnp.pad(w_c, ((0, 0), (0, vocab_pad - vocab)))
        b_p = jnp.pad(b_f32, (0, vocab_pad - vocab),
                      constant_values=_NEG_BIG).reshape(1, vocab_pad)

        cost = pl.CostEstimate(
            flops=4 * m * d_model * vocab_pad,
            transcendentals=m * vocab_pad,
            bytes_accessed=(m * d_model * x_bytes
                            + 2 * m_tiles * d_model * vocab_pad * w_bytes
                            + vocab_pad * 4
                            + m * vocab * out_bytes))

        out2 = pl.pallas_call(
            _fused_head_kernel,
            out_shape=jax.ShapeDtypeStruct((m, vocab), out_dtype),
            grid=(m_tiles, 2, nv),
            in_specs=[
                pl.BlockSpec((tm_, d_model), lambda i, s, j: (i, 0)),
                pl.BlockSpec((d_model, tv_), lambda i, s, j: (0, j)),
                pl.BlockSpec((1, tv_), lambda i, s, j: (0, j)),
            ],
            out_specs=pl.BlockSpec((tm_, tv_), lambda i, s, j: (i, s * j)),
            scratch_shapes=[
                pltpu.VMEM((tm_, 1), jnp.float32),   # running max
                pltpu.VMEM((tm_, 1), jnp.float32),   # running sum
                pltpu.VMEM((tm_, 1), jnp.float32),   # logsumexp
            ],
            compiler_params=pltpu.CompilerParams(
                dimension_semantics=("parallel", "arbitrary", "arbitrary"),
                vmem_limit_bytes=int(vmem_budget)),
            cost_estimate=cost,
        )(x2, w_p, b_p)
        return out2.reshape(*orig_shape[:-1], vocab)

    # ---- decode / small-m path ----
    n_split = 2                      # keep both v7x TensorCores busy when m_tiles == 1
    vocab_pad = _round_up(vocab, n_split * tv_)
    nv = vocab_pad // tv_
    nvh = nv // n_split
    w_p = jnp.pad(w_c, ((0, 0), (0, vocab_pad - vocab)))
    b_p = jnp.pad(b_f32, (0, vocab_pad - vocab),
                  constant_values=_NEG_BIG).reshape(1, vocab_pad)

    cost = pl.CostEstimate(
        flops=2 * m * d_model * vocab_pad,
        transcendentals=m * vocab_pad,
        bytes_accessed=(m * d_model * x_bytes
                        + m_tiles * d_model * vocab_pad * w_bytes
                        + vocab_pad * 4
                        + m * vocab_pad * 4
                        + m * n_split * 4))

    # TODO(synk): on v5e consider pipeline_mode=pl.Buffered(3) on the weight
    # BlockSpec when per-tile compute is shorter than the weight-tile DMA.
    logits_pad, lse_part = pl.pallas_call(
        _split_lse_kernel,
        out_shape=(jax.ShapeDtypeStruct((m, vocab_pad), jnp.float32),
                   jax.ShapeDtypeStruct((n_split, m, 1), jnp.float32)),
        grid=(m_tiles, n_split, nvh),
        in_specs=[
            pl.BlockSpec((tm_, d_model), lambda i, c, j: (i, 0)),
            pl.BlockSpec((d_model, tv_), lambda i, c, j: (0, c * nvh + j)),
            pl.BlockSpec((1, tv_), lambda i, c, j: (0, c * nvh + j)),
        ],
        out_specs=(pl.BlockSpec((tm_, tv_), lambda i, c, j: (i, c * nvh + j)),
                   pl.BlockSpec((1, tm_, 1), lambda i, c, j: (c, i, 0))),
        scratch_shapes=[
            pltpu.VMEM((tm_, 1), jnp.float32),   # running max
            pltpu.VMEM((tm_, 1), jnp.float32),   # running sum
        ],
        compiler_params=pltpu.CompilerParams(
            dimension_semantics=("parallel", "parallel", "arbitrary"),
            vmem_limit_bytes=int(vmem_budget)),
        cost_estimate=cost,
    )(x2, w_p, b_p)

    # Combine per-half partial logsumexps + normalize with plain XLA (memory-bound
    # elementwise pass; replaces the old second pallas_call).
    m_all = jnp.max(lse_part, axis=0)                                   # (m, 1)
    lse = m_all + jnp.log(jnp.sum(jnp.exp(lse_part - m_all), axis=0))   # (m, 1)
    out2 = (logits_pad[:, :vocab] - lse).astype(out_dtype)
    return out2.reshape(*orig_shape[:-1], vocab)


if __name__ == "__main__":
    # Small shapes, deliberately ragged in rows (2*9=18) and vocab (320) so the
    # boundary handling, multi-tile online logsumexp, and both head paths are
    # exercised. Production uses tm=None/tv=None (per-generation defaults).
    batch, seq, d_model, vocab, n_layers = 2, 9, 32, 320, 2

    key = jax.random.PRNGKey(0)
    kx, kw, kb, kg, kbb = jax.random.split(key, 5)

    x = jax.random.normal(kx, (batch, seq, d_model), dtype=jnp.float32)
    bound = 1.0 / jnp.sqrt(jnp.float32(d_model))
    w = jax.random.uniform(kw, (vocab, d_model), minval=-bound, maxval=bound,
                           dtype=jnp.float32)
    b = jax.random.uniform(kb, (vocab,), minval=-bound, maxval=bound,
                           dtype=jnp.float32)
    gamma = 1.0 + 0.1 * jax.random.normal(kg, (d_model,), dtype=jnp.float32)
    beta = 0.1 * jax.random.normal(kbb, (d_model,), dtype=jnp.float32)

    # --- Decoder per-layer LayerNorm (Pallas) vs JAX reference ---
    y = decoder_forward(x, None, None, None, gamma, beta, n_layers)
    y = jax.block_until_ready(y)

    def ln_ref(v):
        mu = jnp.mean(v, axis=-1, keepdims=True)
        var = jnp.mean((v - mu) ** 2, axis=-1, keepdims=True)
        return (v - mu) * lax.rsqrt(var + 1e-6) * gamma + beta

    y_ref = x
    for _ in range(n_layers):
        y_ref = ln_ref(y_ref)
    assert jnp.allclose(y, y_ref, atol=1e-4, rtol=1e-4), "layernorm mismatch"

    # --- Projection + log_softmax head (both paths) vs JAX reference ---
    ref_logits = jnp.dot(
        y.reshape(-1, d_model).astype(jnp.bfloat16),
        w.T.astype(jnp.bfloat16),
        preferred_element_type=jnp.float32,
    ) + b
    mx = jnp.max(ref_logits, axis=-1, keepdims=True)
    ref = (ref_logits - mx) - jnp.log(
        jnp.sum(jnp.exp(ref_logits - mx), axis=-1, keepdims=True))
    ref = ref.reshape(batch, seq, vocab)

    out_fused = generator_forward(y, w.T, b, tm=16, tv=128)   # m_tiles>=2 -> fused path
    out_split = generator_forward(y, w.T, b, tm=64, tv=128)   # m_tiles==1 -> decode/split path
    out_fused, out_split = jax.block_until_ready((out_fused, out_split))

    assert out_fused.shape == (batch, seq, vocab)
    assert out_split.shape == (batch, seq, vocab)
    assert jnp.allclose(out_fused, ref, atol=1e-4, rtol=1e-4), "fused path mismatch"
    assert jnp.allclose(out_split, ref, atol=1e-4, rtol=1e-4), "split path mismatch"

    print("KERNEL_OK")
</pallas_src>

<mosaic_0001>
module attributes {stable_mosaic.version = 11 : i64} {
  func.func @_layernorm_kernel(%arg0: i32, %arg1: memref<24x32xf32, #tpu.memory_space<vmem>>, %arg2: memref<1x32xf32, #tpu.memory_space<vmem>>, %arg3: memref<1x32xf32, #tpu.memory_space<vmem>>, %arg4: memref<24x32xf32, #tpu.memory_space<vmem>>) attributes {dimension_semantics = [#tpu.dimension_semantics<parallel>], iteration_bounds = array<i64: 1>, scalar_prefetch = 0 : i64, scratch_operands = 0 : i64, tpu.core_type = #tpu.core_type<tc>, window_params = [{transform_indices = @transform_0, window_bounds = array<i64: 24, 32>}, {pipeline_mode = #tpu.pipeline_mode<synchronous>, transform_indices = @transform_1, window_bounds = array<i64: 1, 32>}, {pipeline_mode = #tpu.pipeline_mode<synchronous>, transform_indices = @transform_2, window_bounds = array<i64: 1, 32>}, {transform_indices = @transform_3, window_bounds = array<i64: 24, 32>}]} {
    %c0 = arith.constant 0 : index
    %c0_0 = arith.constant 0 : index
    %0 = vector.load %arg1[%c0, %c0_0] : memref<24x32xf32, #tpu.memory_space<vmem>>, vector<24x32xf32>
    %cst = arith.constant dense<0.000000e+00> : vector<24xf32>
    %1 = vector.multi_reduction <add>, %0, %cst [1] : vector<24x32xf32> to vector<24xf32>
    %2 = vector.shape_cast %1 : vector<24xf32> to vector<24x1xf32>
    %cst_1 = arith.constant 3.200000e+01 : f32
    %3 = vector.broadcast %cst_1 : f32 to vector<24x1xf32>
    %4 = arith.divf %2, %3 : vector<24x1xf32>
    %5 = vector.broadcast %4 : vector<24x1xf32> to vector<24x32xf32>
    %6 = arith.subf %0, %5 : vector<24x32xf32>
    %7 = arith.mulf %6, %6 : vector<24x32xf32>
    %cst_2 = arith.constant dense<0.000000e+00> : vector<24xf32>
    %8 = vector.multi_reduction <add>, %7, %cst_2 [1] : vector<24x32xf32> to vector<24xf32>
    %9 = vector.shape_cast %8 : vector<24xf32> to vector<24x1xf32>
    %cst_3 = arith.constant 3.200000e+01 : f32
    %10 = vector.broadcast %cst_3 : f32 to vector<24x1xf32>
    %11 = arith.divf %9, %10 : vector<24x1xf32>
    %cst_4 = arith.constant 9.99999997E-7 : f32
    %12 = vector.broadcast %cst_4 : f32 to vector<24x1xf32>
    %13 = arith.addf %11, %12 : vector<24x1xf32>
    %14 = math.rsqrt %13 : vector<24x1xf32>
    %15 = vector.broadcast %14 : vector<24x1xf32> to vector<24x32xf32>
    %16 = arith.mulf %6, %15 : vector<24x32xf32>
    %c0_5 = arith.constant 0 : index
    %c0_6 = arith.constant 0 : index
    %17 = vector.load %arg2[%c0_5, %c0_6] : memref<1x32xf32, #tpu.memory_space<vmem>>, vector<1x32xf32>
    %18 = vector.broadcast %17 : vector<1x32xf32> to vector<24x32xf32>
    %19 = arith.mulf %16, %18 : vector<24x32xf32>
    %c0_7 = arith.constant 0 : index
    %c0_8 = arith.constant 0 : index
    %20 = vector.load %arg3[%c0_7, %c0_8] : memref<1x32xf32, #tpu.memory_space<vmem>>, vector<1x32xf32>
    %21 = vector.broadcast %20 : vector<1x32xf32> to vector<24x32xf32>
    %22 = arith.addf %19, %21 : vector<24x32xf32>
    %c0_9 = arith.constant 0 : index
    %c0_10 = arith.constant 0 : index
    %23 = vector.load %arg4[%c0_9, %c0_10] : memref<24x32xf32, #tpu.memory_space<vmem>>, vector<24x32xf32>
    tpu.vector_store %arg4[%c0_9, %c0_10], %22 {strides = array<i32>} : memref<24x32xf32, #tpu.memory_space<vmem>>, vector<24x32xf32>,
    return
  }
  func.func @transform_0(%arg0: i32) -> (i32, i32) {
    %c0_i32 = arith.constant 0 : i32
    %c0_i32_0 = arith.constant 0 : i32
    return %arg0, %c0_i32 : i32, i32
  }
  func.func @transform_1(%arg0: i32) -> (i32, i32) {
    %c0_i32 = arith.constant 0 : i32
    %c0_i32_0 = arith.constant 0 : i32
    %c0_i32_1 = arith.constant 0 : i32
    return %c0_i32, %c0_i32_0 : i32, i32
  }
  func.func @transform_2(%arg0: i32) -> (i32, i32) {
    %c0_i32 = arith.constant 0 : i32
    %c0_i32_0 = arith.constant 0 : i32
    %c0_i32_1 = arith.constant 0 : i32
    return %c0_i32, %c0_i32_0 : i32, i32
  }
  func.func @transform_3(%arg0: i32) -> (i32, i32) {
    %c0_i32 = arith.constant 0 : i32
    %c0_i32_0 = arith.constant 0 : i32
    return %arg0, %c0_i32 : i32, i32
  }
}

</mosaic_0001>

<bundles_post_ra>
// kernel: layer_norm.1
= control target key start
LH: loop header
LB: loop body
LE: loop exit
PB: predicated region body
PF: predicated region fallthrough
CT: control target
= control target key end

     0   :  { %vm17_vm0 = vcmask 261120   ;;  %v123_v6 = vmov 32.0   ;;  %s177_s0 = inlined_call_operand.vmem [shape: f32[18,32], index: 0, kind: input, shape index: {}]   ;;  %s178_s1 = inlined_call_operand.vmem [shape: f32[1,32], index: 1, kind: input, shape index: {}]   ;;  %s179_s2 = inlined_call_operand.vmem [shape: f32[1,32], index: 2, kind: input, shape index: {}]   ;;  %s180_s3 = inlined_call_operand.vmem [shape: f32[18,32], index: 3, kind: output, shape index: {}]  }
   0x1   :  { %v14_v0 = vld [vmem:[%s177_s0] sm:$0xff]  ;;  %v16_v1 = vld [vmem:[%s177_s0 + $0x10] sm:$0xff]  ;;  %v15_v4 = vld [vmem:[%s177_s0 + $0x8] sm:$0xff]  ;;  %115 = vrcp.f32 %v123_v6 }
   0x2   :  { %v18_v2 = vsel %vm17_vm0, %v14_v0, 0.0  ;;  %v24_v3 = vsel %vm17_vm0, %v16_v1, 0.0  ;;  %v21_v5 = vsel %vm17_vm0, %v15_v4, 0.0  ;;  %v113_v45 = vld [vmem:[%s178_s1] ss:$0 sm:$0xff] }
   0x3   :  { %19 = vadd.xlane.f32.xlu0 %v18_v2  ;;  %25 = vadd.xlane.f32.xlu1 %v24_v3  ;;  %v114_v48 = vld [vmem:[%s179_s2] ss:$0 sm:$0xff] }
   0x7   :  { %v116_v7 = vpop.eup %115 }
   0x8   :  { %v28_v8 = vmul.f32 32.0, %v116_v7  ;;  %vm32_vm1 = vweird.f32 %v116_v7 }
   0xa   :  { %v29_v9 = vsub.f32 1.0, %v28_v8 }
   0xb   :  { %22 = vadd.xlane.f32.xlu0 %v21_v5 }
   0xc   :  { %v30_v10 = vmul.f32 %v116_v7, %v29_v9 }
   0xe   :  { %v31_v11 = vadd.f32 %v116_v7, %v30_v10 }
  0x10   :  { %v33_v12 = vsel %vm32_vm1, %v116_v7, %v31_v11 }
  0x76   :  { %v20_v13 = vpop.xlane.xlu0 %19  ;;  %v26_v17 = vpop.xlane.xlu1 %25 }
  0x77   :  { %v34_v14 = vmul.f32 %v33_v12, %v20_v13  ;;  %v36_v21 = vmul.f32 %v33_v12, %v26_v17 }
  0x79   :  { %v37_v15 = vsub.f32 %v14_v0, %v34_v14  ;;  %v39_v23 = vsub.f32 %v16_v1, %v36_v21 }
  0x7b   :  { %v40_v16 = vmul.f32 %v37_v15, %v37_v15  ;;  %v42_v26 = vmul.f32 %v39_v23, %v39_v23 }
  0x7d   :  { %v43_v18 = vsel %vm17_vm0, %v40_v16, 0.0  ;;  %v49_v27 = vsel %vm17_vm0, %v42_v26, 0.0 }
  0x7e   :  { %44 = vadd.xlane.f32.xlu1 %v43_v18  ;;  %v23_v19 = vpop.xlane.xlu0 %22 }
  0x7f   :  { %v35_v20 = vmul.f32 %v33_v12, %v23_v19 }
  0x81   :  { %v38_v22 = vsub.f32 %v15_v4, %v35_v20 }
  0x83   :  { %v41_v24 = vmul.f32 %v38_v22, %v38_v22 }
  0x85   :  { %v46_v25 = vsel %vm17_vm0, %v41_v24, 0.0 }
  0x86   :  { %47 = vadd.xlane.f32.xlu2 %v46_v25 }
  0x8e   :  { %50 = vadd.xlane.f32.xlu2 %v49_v27 }
  0xf1   :  { %v45_v28 = vpop.xlane.xlu1 %44 }
  0xf2   :  { %v52_v29 = vmul.f32 %v45_v28, %v33_v12 }
  0xf4   :  { %v55_v30 = vadd.f32 1e-06, %v52_v29 }
  0xf6   :  { %117 = vrsqrt.f32 %v55_v30  ;;  %vm64_vm3 = vweird.f32 %v55_v30 }
  0xf9   :  { %v48_v31 = vpop.xlane.xlu2 %47 }
  0xfa   :  { %v53_v32 = vmul.f32 %v48_v31, %v33_v12 }
  0xfc   :  { %v118_v33 = vpop.eup %117  ;;  %v56_v34 = vadd.f32 1e-06, %v53_v32 }
  0xfd   :  { %v59_v35 = vmul.f32 %v118_v33, %v55_v30  ;;  %vm65_vm2 = vweird.f32 %v118_v33 }
  0xfe   :  { %119 = vrsqrt.f32 %v56_v34  ;;  %vm66_vm4 = vmor %vm64_vm3, %vm65_vm2  ;;  %vm74_vm6 = vweird.f32 %v56_v34 }
  0xff   :  { %v60_v36 = vmul.f32 %v118_v33, %v59_v35 }
 0x101   :  { %v61_v37 = vmul.f32 0.5, %v60_v36  ;;  %v51_v38 = vpop.xlane.xlu2 %50 }
 0x102   :  { %v54_v39 = vmul.f32 %v51_v38, %v33_v12 }
 0x103   :  { %v62_v40 = vsub.f32 1.5, %v61_v37 }
 0x104   :  { %v120_v41 = vpop.eup %119  ;;  %v57_v42 = vadd.f32 1e-06, %v54_v39 }
 0x105   :  { %v63_v43 = vmul.f32 %v118_v33, %v62_v40  ;;  %v69_v44 = vmul.f32 %v120_v41, %v56_v34  ;;  %vm75_vm5 = vweird.f32 %v120_v41 }
 0x106   :  { %121 = vrsqrt.f32 %v57_v42  ;;  %vm76_vm7 = vmor %vm74_vm6, %vm75_vm5  ;;  %vm84_vm9 = vweird.f32 %v57_v42 }
 0x107   :  { %v67_v46 = vsel %vm66_vm4, %v118_v33, %v63_v43  ;;  %v70_v47 = vmul.f32 %v120_v41, %v69_v44 }
 0x108   :  { %v88_v49 = vmul.f32 %v67_v46, %v37_v15 }
 0x109   :  { %v71_v50 = vmul.f32 0.5, %v70_v47 }
 0x10a   :  { %v95_v51 = vmul.f32 %v113_v45, %v88_v49 }
 0x10b   :  { %v72_v52 = vsub.f32 1.5, %v71_v50 }
 0x10c   :  { %v122_v53 = vpop.eup %121  ;;  %v102_v54 = vadd.f32 %v114_v48, %v95_v51 }
 0x10d   :  { %v73_v55 = vmul.f32 %v120_v41, %v72_v52  ;;  %v79_v56 = vmul.f32 %v122_v53, %v57_v42  ;;  %vm85_vm8 = vweird.f32 %v122_v53 }
 0x10e   :  { %105 = vst.msk [vmem:[%s180_s3] sm:$0xff] %vm17_vm0, %v102_v54  ;;  %vm86_vm10 = vmor %vm84_vm9, %vm85_vm8 }
 0x10f   :  { %v77_v57 = vsel %vm76_vm7, %v120_v41, %v73_v55  ;;  %v80_v58 = vmul.f32 %v122_v53, %v79_v56 }
 0x110   :  { %v89_v59 = vmul.f32 %v77_v57, %v38_v22 }
 0x111   :  { %v81_v60 = vmul.f32 0.5, %v80_v58 }
 0x112   :  { %v96_v61 = vmul.f32 %v113_v45, %v89_v59 }
 0x113   :  { %v82_v62 = vsub.f32 1.5, %v81_v60 }
 0x114   :  { %v103_v63 = vadd.f32 %v114_v48, %v96_v61 }
 0x115   :  { %v83_v0 = vmul.f32 %v122_v53, %v82_v62 }
 0x116   :  { %106 = vst.msk [vmem:[%s180_s3 + $0x8] sm:$0xff] %vm17_vm0, %v103_v63 }
 0x117   :  { %v87_v1 = vsel %vm86_vm10, %v122_v53, %v83_v0 }
 0x118   :  { %v90_v2 = vmul.f32 %v87_v1, %v39_v23 }
 0x11a   :  { %v97_v3 = vmul.f32 %v113_v45, %v90_v2 }
 0x11c   :  { %v104_v4 = vadd.f32 %v114_v48, %v97_v3 }
 0x11e   :  { %107 = vst.msk [vmem:[%s180_s3 + $0x10] sm:$0xff] %vm17_vm0, %v104_v4 }

</bundles_post_ra>
